<compile_context>
chip_gen: v6e
topology: v6e:2x2x1
jax: 0.10.0
libtpu: 0.0.40
codegen_flags: <defaults>
</compile_context>

<pallas_src>
import jax
import jax.numpy as jnp
from jax.experimental import pallas as pl
from jax.experimental.pallas import tpu as pltpu


def _sink_cat_kernel(x_ref, o_ref):
    # One transcendental per element: tanh(relu(x)) == relu(tanh(x)).
    t = jnp.tanh(x_ref[...])
    d = t.shape[-1]
    r = jnp.maximum(t, 0.0).astype(o_ref.dtype)
    t = t.astype(o_ref.dtype)
    if d % 128 == 0:
        # Both halves are 128-lane-aligned, lane-dense, unmasked stores.
        o_ref[:, :d] = t
        o_ref[:, d:] = r
    else:
        # Misaligned D: build the full (TN, 2D) row in registers and issue a
        # single full-block store (no masked partial stores).
        o_ref[...] = jnp.concatenate([t, r], axis=-1)


def _round_up(v, m):
    return -(-v // m) * m


def _round_down(v, m):
    return (v // m) * m


def sink_cat(x, *, vmem_budget_bytes=8 << 20):
    """y = tanh(concat([x, relu(x)], axis=1)) for 2-D x of shape (N, D)."""
    n, d = x.shape
    itemsize = jnp.dtype(x.dtype).itemsize

    # Sublane-packing multiple: 8 for 4-byte, 16 for 2-byte, 32 for 1-byte dtypes.
    row_mult = max(8, 32 // itemsize)

    # Double-buffered VMEM bytes per row per grid step:
    #   2 buffers * (input D + output 2D) * itemsize = 6 * itemsize * D.
    bytes_per_row = 2 * 3 * d * itemsize
    tn = _round_down(max(row_mult, vmem_budget_bytes // bytes_per_row), row_mult)

    if tn >= n:
        if n >= 2 * row_mult:
            # Whole array fits in one budgeted block: still split into >= 2
            # "parallel" steps so both v7x TensorCores get work.
            tn = _round_up(_round_up(n, 2) // 2, row_mult)
        else:
            tn = n  # single full-extent block (legal for any N)

    grid = (pl.cdiv(n, tn),)

    return pl.pallas_call(
        _sink_cat_kernel,
        out_shape=jax.ShapeDtypeStruct((n, 2 * d), x.dtype),
        grid=grid,
        in_specs=[pl.BlockSpec((tn, d), lambda i: (i, 0))],
        out_specs=pl.BlockSpec((tn, 2 * d), lambda i: (i, 0)),
        compiler_params=pltpu.CompilerParams(
            dimension_semantics=("parallel",),
        ),
    )(x)


if __name__ == "__main__":
    # Small 2-D shape consistent with the module's input (torch.randn(3, 2));
    # use a slightly larger but still small (N, D) for TPU friendliness.
    key = jax.random.PRNGKey(0)
    x = jax.random.normal(key, (8, 32), dtype=jnp.float32)

    y = jax.block_until_ready(sink_cat(x))
    y_ref = jnp.tanh(jnp.concatenate([x, jnp.maximum(x, 0.0)], axis=1))
    assert y.shape == (x.shape[0], 2 * x.shape[1])
    assert jnp.allclose(y, y_ref, atol=1e-6, rtol=1e-6)

    # Extra sanity check: exercises the aligned-store path (D % 128 == 0) and a
    # multi-step "parallel" grid.
    x2 = jax.random.normal(jax.random.PRNGKey(1), (64, 256), dtype=jnp.float32)
    y2 = jax.block_until_ready(sink_cat(x2))
    y2_ref = jnp.tanh(jnp.concatenate([x2, jnp.maximum(x2, 0.0)], axis=1))
    assert jnp.allclose(y2, y2_ref, atol=1e-6, rtol=1e-6)

    print("KERNEL_OK")
</pallas_src>

<mosaic_0001>
module attributes {stable_mosaic.version = 11 : i64} {
  func.func @_sink_cat_kernel(%arg0: i32, %arg1: memref<8x32xf32, #tpu.memory_space<vmem>>, %arg2: memref<8x64xf32, #tpu.memory_space<vmem>>) attributes {dimension_semantics = [#tpu.dimension_semantics<parallel>], iteration_bounds = array<i64: 1>, scalar_prefetch = 0 : i64, scratch_operands = 0 : i64, tpu.core_type = #tpu.core_type<tc>, window_params = [{transform_indices = @transform_0, window_bounds = array<i64: 8, 32>}, {transform_indices = @transform_1, window_bounds = array<i64: 8, 64>}]} {
    %c0 = arith.constant 0 : index
    %c0_0 = arith.constant 0 : index
    %0 = vector.load %arg1[%c0, %c0_0] : memref<8x32xf32, #tpu.memory_space<vmem>>, vector<8x32xf32>
    %1 = math.tanh %0 : vector<8x32xf32>
    %cst = arith.constant 0.000000e+00 : f32
    %2 = vector.broadcast %cst : f32 to vector<8x32xf32>
    %3 = arith.maximumf %1, %2 : vector<8x32xf32>
    %4 = tpu.concatenate %1, %3 in 1 : vector<8x32xf32>, vector<8x32xf32> -> vector<8x64xf32>
    %c0_1 = arith.constant 0 : index
    %c0_2 = arith.constant 0 : index
    %5 = vector.load %arg2[%c0_1, %c0_2] : memref<8x64xf32, #tpu.memory_space<vmem>>, vector<8x64xf32>
    tpu.vector_store %arg2[%c0_1, %c0_2], %4 {strides = array<i32>} : memref<8x64xf32, #tpu.memory_space<vmem>>, vector<8x64xf32>,
    return
  }
  func.func @transform_0(%arg0: i32) -> (i32, i32) {
    %c0_i32 = arith.constant 0 : i32
    %c0_i32_0 = arith.constant 0 : i32
    return %arg0, %c0_i32 : i32, i32
  }
  func.func @transform_1(%arg0: i32) -> (i32, i32) {
    %c0_i32 = arith.constant 0 : i32
    %c0_i32_0 = arith.constant 0 : i32
    return %arg0, %c0_i32 : i32, i32
  }
}

</mosaic_0001>

<bundles_post_ra>
// kernel: tpu_custom_call.1
= control target key start
LH: loop header
LB: loop body
LE: loop exit
PB: predicated region body
PF: predicated region fallthrough
CT: control target
= control target key end

     0   :  { %6 = vsyncpa [#allocation3], 0  ;;  %s115_s0 = inlined_call_operand.hbm [shape: f32[8,32], index: 0, kind: input, shape index: {}]   ;;  %s116_s1 = inlined_call_operand.hbm [shape: f32[8,64], index: 1, kind: output, shape index: {}]  }
   0x1   :  { %7 = vsyncpa [#allocation4], 0  ;;  %s96_s6 = smov [#allocation2]  }
   0x2   :  { %s14_s7 = sshll.u32 %s96_s6, 4  ;;  %s15_s7 = int_to_ptr.vmem [resolvable:$true] %s14_s7 }
   0x3   :  { %s60_s8 = scalar_lea.vmem %s15_s7, 128  ;;  %p65_p1 = scmp.lt.s32.totalorder %s15_s7, %s15_s7 }
   0x4   :  { %p61_p0 = scmp.ne.s32.totalorder %s15_s7, %s60_s8  ;;  %p66_p2 = scmp.lt.s32.totalorder %s60_s8, %s60_s8 }
   0x6   :  { %p67_p3 = por %p66_p2, %p65_p1 }
   0x8   :  { %p68_p4 = pnand %p67_p3, %p61_p0 }
   0xa   :  { %71 = shalt.err (!%p68_p4)
}
   0xb   :  { %17 = dma.hbm_to_vmem [thread:$0]  %s115_s0, 128, %s15_s7, [#allocation3]  }
   0xc   :  { %92 = dma.done.wait [#allocation3], 128  }
   0xd   :  { %93 = vsyncadd [#allocation3], 4294967168  ;;  %v21_v0 = vld [vmem:[#allocation2] sm:$0xff]  ;;  %s97_s11 = smov 32   ;;  %s98_s12 = smov [#allocation5]   ;;  %vm28_vm0 = vcmask 261120  }
   0xe   :  { %50 = vtanh.f32 %v21_v0  ;;  %s38_s13 = sshll.u32 %s98_s12, 4  ;;  %vm30_vm1 = vcmask 523264   ;;  %s39_s13 = int_to_ptr.vmem [resolvable:$true] %s38_s13 }
   0xf   :  { %s72_s14 = scalar_lea.vmem %s39_s13, 128  ;;  %p77_p6 = scmp.lt.s32.totalorder %s39_s13, %s39_s13 }
  0x10   :  { %p73_p5 = scmp.ne.s32.totalorder %s39_s13, %s72_s14  ;;  %p78_p7 = scmp.lt.s32.totalorder %s72_s14, %s72_s14 }
  0x12   :  { %p79_p8 = por %p78_p7, %p77_p6 }
  0x14   :  { %p80_p9 = pnand %p79_p8, %p73_p5 }
  0x1b   :  { %v51_v1 = vpop.eup %50 }
  0x1c   :  { %v23_v2 = vmax.f32 %v51_v1, 0.0 }
  0x1e   :  { %25 = vrot.lane.b32.xlu0 %v23_v2, %s97_s11 }
  0x90   :  { %v26_v3 = vpop.permute.xlu0 %25 }
  0x91   :  { %v29_v4 = vsel %vm28_vm0, %v51_v1, %v26_v3 }
  0x92   :  { %31 = vst.msk [vmem:[#allocation5] sm:$0xff] %vm30_vm1, %v29_v4 }
  0x93   :  { %83 = shalt.err (!%p80_p9)
}
  0x94   :  { %41 = dma.vmem_to_hbm [thread:$0]  %s39_s13, 128, %s116_s1, [#allocation4]  }
  0x95   :  { %94 = dma.done.wait [#allocation4], 128  }
  0x96   :  { %95 = vsyncadd [#allocation4], 4294967168 }
  0x97   :  { %45 = vsyncpa [#allocation3], 1 }
  0x98   :  { %46 = vsyncpa [#allocation4], 1 }

</bundles_post_ra>
